<compile_context>
chip_gen: v6e
topology: v6e:2x2x1
jax: 0.10.0
libtpu: 0.0.40
codegen_flags: <defaults>
</compile_context>

<pallas_src>
import functools

import jax
import jax.numpy as jnp
from jax.experimental import pallas as pl
from jax.experimental.pallas import tpu as pltpu


# ------------------------------ Pallas kernel -------------------------------

def fused_kernel(x_ref, wf_ref, bf_ref, w12_ref, b12_ref, bnsc_ref, bnsh_ref,
                 o1_ref, o2_ref, xpad_ref, fbpad_ref, col_ref):
    """Per-batch fused forward: fbank -> log-mean-norm -> dual conv + stitch
    (folded into one matmul) -> ReLU -> BN(eval) affine."""
    Cout, T = o1_ref.shape
    Cf, Kf = wf_ref.shape
    K = w12_ref.shape[1] // Cf
    pad_f, pad_c = Kf // 2, K // 2

    # ---- stage 1: fbank Conv1d(1->Cf) + ReLU, +1e-6, log, mean-subtract ----
    # Halo handled in VMEM; scratch fully rewritten every grid step.
    xpad_ref[...] = jnp.zeros_like(xpad_ref)
    xpad_ref[:, pad_f:pad_f + T] = x_ref[...]
    xp = xpad_ref[...]                                   # (1, T + Kf - 1)
    wf = wf_ref[...]                                     # (Cf, Kf)
    acc = jnp.broadcast_to(bf_ref[...], (Cf, T)).astype(jnp.float32)
    for k in range(Kf):                                  # 1-in-channel conv: VPU
        acc = acc + wf[:, k:k + 1] * xp[:, k:k + T]
    fb = jnp.log(jnp.maximum(acc, 0.0) + 1e-6)           # ReLU, +1e-6, log
    fb = fb - jnp.mean(fb, axis=-1, keepdims=True)       # (Cf, T)

    # ---- stage 2: merged source/target conv with cross-stitch folded in ----
    fbpad_ref[...] = jnp.zeros_like(fbpad_ref)
    fbpad_ref[:, pad_c:pad_c + T] = fb
    fbp = fbpad_ref[...]                                 # (Cf, T + K - 1)
    for k in range(K):                                   # im2col: K shifted copies
        col_ref[k * Cf:(k + 1) * Cf, :] = fbp[:, k:k + T]

    # One fat MXU matmul covers both conv branches and the 2x2 stitch mix.
    z = jnp.dot(w12_ref[...], col_ref[...],
                preferred_element_type=jnp.float32) + b12_ref[...]
    z = jnp.maximum(z, 0.0)                              # ReLU
    z = z * bnsc_ref[...] + bnsh_ref[...]                # BatchNorm1d (eval) affine
    o1_ref[...] = z[:Cout]
    o2_ref[...] = z[Cout:]


# ------------------------------ Wrapper (glue) -------------------------------

def cross_stitch_forward(x, params):
    """x: (B, 1, T) float32.  Returns (o1, o2) each (B, Cout*T)."""
    B, _, T = x.shape
    Wf, bf = params["Wf"], params["bf"]           # (Cf, 1, Kf), (Cf,)
    W1, b1 = params["W1"], params["b1"]           # (Cout, Cf, K), (Cout,)
    W2, b2 = params["W2"], params["b2"]
    stitch = params["stitch"]                     # (Cout, 2, 2)
    bn1, bn2 = params["bn1"], params["bn2"]       # (Cout, 2) [scale, shift]

    Cf, _, Kf = Wf.shape
    Cout, _, K = W1.shape

    # Fold the CrossStitchUnit (per-channel 2x2) into the conv weights/biases.
    # Valid because both branches consume the same fbank output (x1 == x2).
    s00, s01 = stitch[:, 0, 0], stitch[:, 0, 1]
    s10, s11 = stitch[:, 1, 0], stitch[:, 1, 1]
    W1p = s00[:, None, None] * W1 + s01[:, None, None] * W2
    W2p = s10[:, None, None] * W1 + s11[:, None, None] * W2
    b1p = s00 * b1 + s01 * b2
    b2p = s10 * b1 + s11 * b2
    Wcat = jnp.concatenate([W1p, W2p], axis=0)            # (2*Cout, Cf, K)
    # im2col weight layout: column index = k*Cf + c
    W12 = jnp.transpose(Wcat, (0, 2, 1)).reshape(2 * Cout, K * Cf)
    b12 = jnp.concatenate([b1p, b2p])[:, None]             # (2*Cout, 1)
    bnsc = jnp.concatenate([bn1[:, 0], bn2[:, 0]])[:, None]
    bnsh = jnp.concatenate([bn1[:, 1], bn2[:, 1]])[:, None]

    # Weight/bias/BN operands have constant index_maps (fetched once per core).
    o1, o2 = pl.pallas_call(
        fused_kernel,
        out_shape=(jax.ShapeDtypeStruct((B, Cout, T), jnp.float32),
                   jax.ShapeDtypeStruct((B, Cout, T), jnp.float32)),
        grid_spec=pltpu.PrefetchScalarGridSpec(
            num_scalar_prefetch=0,
            grid=(B,),   # kept >= 2 and "parallel" so v7x's two TCs share work
            in_specs=[
                pl.BlockSpec((None, 1, T), lambda b: (b, 0, 0)),
                pl.BlockSpec((Cf, Kf), lambda b: (0, 0)),
                pl.BlockSpec((Cf, 1), lambda b: (0, 0)),
                pl.BlockSpec((2 * Cout, K * Cf), lambda b: (0, 0)),
                pl.BlockSpec((2 * Cout, 1), lambda b: (0, 0)),
                pl.BlockSpec((2 * Cout, 1), lambda b: (0, 0)),
                pl.BlockSpec((2 * Cout, 1), lambda b: (0, 0)),
            ],
            out_specs=[pl.BlockSpec((None, Cout, T), lambda b: (b, 0, 0)),
                       pl.BlockSpec((None, Cout, T), lambda b: (b, 0, 0))],
            scratch_shapes=[
                pltpu.VMEM((1, T + Kf - 1), jnp.float32),   # x halo buffer
                pltpu.VMEM((Cf, T + K - 1), jnp.float32),   # fbank halo buffer
                pltpu.VMEM((K * Cf, T), jnp.float32),       # im2col buffer
            ]),
        compiler_params=pltpu.CompilerParams(dimension_semantics=("parallel",)),
    )(x, Wf[:, 0, :], bf[:, None], W12, b12, bnsc, bnsh)

    # final: x.contiguous().view(B, -1) for both task outputs
    return o1.reshape(B, -1), o2.reshape(B, -1)


# --------------------------- Pure-JAX reference ------------------------------
# Literal (unfolded) formulation of the module semantics; validates both the
# fused kernel and the stitch-into-weights folding.

def _conv1d_ref(x, w, b, pad):
    y = jax.lax.conv_general_dilated(
        x, w, window_strides=(1,), padding=[(pad, pad)],
        dimension_numbers=("NCH", "OIH", "NCH"))
    return y + b[None, :, None]


def reference_forward(x, params):
    Wf, bf = params["Wf"], params["bf"]
    W1, b1 = params["W1"], params["b1"]
    W2, b2 = params["W2"], params["b2"]
    st = params["stitch"]
    bn1, bn2 = params["bn1"], params["bn2"]
    B = x.shape[0]

    y = _conv1d_ref(x, Wf, bf, Wf.shape[2] // 2)
    y = jnp.maximum(y, 0.0) + 1e-6
    y = jnp.log(y)
    y = y - jnp.mean(y, axis=-1, keepdims=True)
    x1 = x2 = y

    c1 = _conv1d_ref(x1, W1, b1, W1.shape[2] // 2)
    c2 = _conv1d_ref(x2, W2, b2, W2.shape[2] // 2)
    # CrossStitchUnit: per-channel [[s00, s01], [s10, s11]] applied to (c1, c2)
    z1 = st[:, 0, 0][None, :, None] * c1 + st[:, 0, 1][None, :, None] * c2
    z2 = st[:, 1, 0][None, :, None] * c1 + st[:, 1, 1][None, :, None] * c2
    z1 = jnp.maximum(z1, 0.0)
    z2 = jnp.maximum(z2, 0.0)
    o1 = z1 * bn1[None, :, 0, None] + bn1[None, :, 1, None]
    o2 = z2 * bn2[None, :, 0, None] + bn2[None, :, 1, None]
    return o1.reshape(B, -1), o2.reshape(B, -1)


# ---------------------------------- Main -------------------------------------

def make_params(key, Cf=8, Cout=16, Kf=5, K=5):
    ks = jax.random.split(key, 14)
    p = {}
    p["Wf"] = jax.random.normal(ks[0], (Cf, 1, Kf), jnp.float32) * 0.3
    p["bf"] = jax.random.normal(ks[1], (Cf,), jnp.float32) * 0.1
    p["W1"] = jax.random.normal(ks[2], (Cout, Cf, K), jnp.float32) / jnp.sqrt(Cf * K)
    p["b1"] = jax.random.normal(ks[3], (Cout,), jnp.float32) * 0.1
    p["W2"] = jax.random.normal(ks[4], (Cout, Cf, K), jnp.float32) / jnp.sqrt(Cf * K)
    p["b2"] = jax.random.normal(ks[5], (Cout,), jnp.float32) * 0.1
    # CrossStitchUnit init: one [[0.9, 0.1], [0.1, 0.9]] per channel.
    p["stitch"] = jnp.tile(jnp.array([[0.9, 0.1], [0.1, 0.9]], jnp.float32),
                           (Cout, 1, 1))
    # BatchNorm1d (eval) folded to per-channel scale/shift.
    eps = 1e-5
    for name, k0 in (("bn1", 6), ("bn2", 10)):
        gamma = 1.0 + 0.1 * jax.random.normal(ks[k0], (Cout,), jnp.float32)
        beta = 0.1 * jax.random.normal(ks[k0 + 1], (Cout,), jnp.float32)
        rmean = 0.05 * jax.random.normal(ks[k0 + 2], (Cout,), jnp.float32)
        rvar = 0.5 + jnp.abs(jax.random.normal(ks[k0 + 3], (Cout,), jnp.float32)) * 0.2
        scale = gamma / jnp.sqrt(rvar + eps)
        shift = beta - rmean * scale
        p[name] = jnp.stack([scale, shift], axis=1)  # (Cout, 2)
    return p


if __name__ == "__main__":
    B, T_in = 2, 128
    key = jax.random.PRNGKey(0)
    kx, kp = jax.random.split(key)
    x = jax.random.normal(kx, (B, 1, T_in), jnp.float32)
    params = make_params(kp)

    fwd = jax.jit(functools.partial(cross_stitch_forward, params=params))
    o1, o2 = fwd(x)
    jax.block_until_ready((o1, o2))

    r1, r2 = reference_forward(x, params)
    assert o1.shape == r1.shape and o2.shape == r2.shape
    assert jnp.allclose(o1, r1, rtol=1e-4, atol=1e-4), "output1 mismatch"
    assert jnp.allclose(o2, r2, rtol=1e-4, atol=1e-4), "output2 mismatch"

    print("KERNEL_OK")
</pallas_src>

<mosaic_0001>
module attributes {stable_mosaic.version = 11 : i64} {
  func.func @fused_kernel(%arg0: i32, %arg1: memref<1x1x128xf32, #tpu.memory_space<vmem>>, %arg2: memref<8x5xf32, #tpu.memory_space<vmem>>, %arg3: memref<8x1xf32, #tpu.memory_space<vmem>>, %arg4: memref<32x40xf32, #tpu.memory_space<vmem>>, %arg5: memref<32x1xf32, #tpu.memory_space<vmem>>, %arg6: memref<32x1xf32, #tpu.memory_space<vmem>>, %arg7: memref<32x1xf32, #tpu.memory_space<vmem>>, %arg8: memref<1x16x128xf32, #tpu.memory_space<vmem>>, %arg9: memref<1x16x128xf32, #tpu.memory_space<vmem>>, %arg10: memref<1x132xf32, #tpu.memory_space<vmem>>, %arg11: memref<8x132xf32, #tpu.memory_space<vmem>>, %arg12: memref<40x128xf32, #tpu.memory_space<vmem>>) attributes {dimension_semantics = [#tpu.dimension_semantics<parallel>], iteration_bounds = array<i64: 2>, scalar_prefetch = 0 : i64, scratch_operands = 3 : i64, tpu.core_type = #tpu.core_type<tc>, window_params = [{transform_indices = @transform_0, window_bounds = array<i64: 1, 1, 128>}, {pipeline_mode = #tpu.pipeline_mode<synchronous>, transform_indices = @transform_1, window_bounds = array<i64: 8, 5>}, {pipeline_mode = #tpu.pipeline_mode<synchronous>, transform_indices = @transform_2, window_bounds = array<i64: 8, 1>}, {pipeline_mode = #tpu.pipeline_mode<synchronous>, transform_indices = @transform_3, window_bounds = array<i64: 32, 40>}, {pipeline_mode = #tpu.pipeline_mode<synchronous>, transform_indices = @transform_4, window_bounds = array<i64: 32, 1>}, {pipeline_mode = #tpu.pipeline_mode<synchronous>, transform_indices = @transform_5, window_bounds = array<i64: 32, 1>}, {pipeline_mode = #tpu.pipeline_mode<synchronous>, transform_indices = @transform_6, window_bounds = array<i64: 32, 1>}, {transform_indices = @transform_7, window_bounds = array<i64: 1, 16, 128>}, {transform_indices = @transform_8, window_bounds = array<i64: 1, 16, 128>}]} {
    %cst = arith.constant 0.000000e+00 : f32
    %0 = vector.broadcast %cst : f32 to vector<1x132xf32>
    %c0 = arith.constant 0 : index
    %c0_0 = arith.constant 0 : index
    %1 = vector.load %arg10[%c0, %c0_0] : memref<1x132xf32, #tpu.memory_space<vmem>>, vector<1x132xf32>
    tpu.vector_store %arg10[%c0, %c0_0], %0 {strides = array<i32>} : memref<1x132xf32, #tpu.memory_space<vmem>>, vector<1x132xf32>,
    %c0_1 = arith.constant 0 : index
    %c0_2 = arith.constant 0 : index
    %c0_3 = arith.constant 0 : index
    %2 = vector.load %arg1[%c0_1, %c0_2, %c0_3] : memref<1x1x128xf32, #tpu.memory_space<vmem>>, vector<1x1x128xf32>
    %3 = vector.shape_cast %2 : vector<1x1x128xf32> to vector<1x128xf32>
    %c0_4 = arith.constant 0 : index
    %c2 = arith.constant 2 : index
    %4 = vector.load %arg10[%c0_4, %c2] : memref<1x132xf32, #tpu.memory_space<vmem>>, vector<1x128xf32>
    tpu.vector_store %arg10[%c0_4, %c2], %3 {strides = array<i32>} : memref<1x132xf32, #tpu.memory_space<vmem>>, vector<1x128xf32>,
    %c0_5 = arith.constant 0 : index
    %c0_6 = arith.constant 0 : index
    %5 = vector.load %arg10[%c0_5, %c0_6] : memref<1x132xf32, #tpu.memory_space<vmem>>, vector<1x132xf32>
    %c0_7 = arith.constant 0 : index
    %c0_8 = arith.constant 0 : index
    %6 = vector.load %arg2[%c0_7, %c0_8] : memref<8x5xf32, #tpu.memory_space<vmem>>, vector<8x5xf32>
    %c0_9 = arith.constant 0 : index
    %c0_10 = arith.constant 0 : index
    %7 = vector.load %arg3[%c0_9, %c0_10] : memref<8x1xf32, #tpu.memory_space<vmem>>, vector<8x1xf32>
    %8 = vector.shape_cast %7 : vector<8x1xf32> to vector<8x1xf32>
    %9 = vector.broadcast %8 : vector<8x1xf32> to vector<8x128xf32>
    %10 = vector.extract_strided_slice %6 {offsets = [0, 0], sizes = [8, 1], strides = [1, 1]} : vector<8x5xf32> to vector<8x1xf32>
    %11 = vector.extract_strided_slice %5 {offsets = [0, 0], sizes = [1, 128], strides = [1, 1]} : vector<1x132xf32> to vector<1x128xf32>
    %12 = vector.broadcast %10 : vector<8x1xf32> to vector<8x128xf32>
    %13 = vector.broadcast %11 : vector<1x128xf32> to vector<8x128xf32>
    %14 = arith.mulf %12, %13 : vector<8x128xf32>
    %15 = arith.addf %9, %14 : vector<8x128xf32>
    %16 = vector.extract_strided_slice %6 {offsets = [0, 1], sizes = [8, 1], strides = [1, 1]} : vector<8x5xf32> to vector<8x1xf32>
    %17 = vector.extract_strided_slice %5 {offsets = [0, 1], sizes = [1, 128], strides = [1, 1]} : vector<1x132xf32> to vector<1x128xf32>
    %18 = vector.broadcast %16 : vector<8x1xf32> to vector<8x128xf32>
    %19 = vector.broadcast %17 : vector<1x128xf32> to vector<8x128xf32>
    %20 = arith.mulf %18, %19 : vector<8x128xf32>
    %21 = arith.addf %15, %20 : vector<8x128xf32>
    %22 = vector.extract_strided_slice %6 {offsets = [0, 2], sizes = [8, 1], strides = [1, 1]} : vector<8x5xf32> to vector<8x1xf32>
    %23 = vector.extract_strided_slice %5 {offsets = [0, 2], sizes = [1, 128], strides = [1, 1]} : vector<1x132xf32> to vector<1x128xf32>
    %24 = vector.broadcast %22 : vector<8x1xf32> to vector<8x128xf32>
    %25 = vector.broadcast %23 : vector<1x128xf32> to vector<8x128xf32>
    %26 = arith.mulf %24, %25 : vector<8x128xf32>
    %27 = arith.addf %21, %26 : vector<8x128xf32>
    %28 = vector.extract_strided_slice %6 {offsets = [0, 3], sizes = [8, 1], strides = [1, 1]} : vector<8x5xf32> to vector<8x1xf32>
    %29 = vector.extract_strided_slice %5 {offsets = [0, 3], sizes = [1, 128], strides = [1, 1]} : vector<1x132xf32> to vector<1x128xf32>
    %30 = vector.broadcast %28 : vector<8x1xf32> to vector<8x128xf32>
    %31 = vector.broadcast %29 : vector<1x128xf32> to vector<8x128xf32>
    %32 = arith.mulf %30, %31 : vector<8x128xf32>
    %33 = arith.addf %27, %32 : vector<8x128xf32>
    %34 = vector.extract_strided_slice %6 {offsets = [0, 4], sizes = [8, 1], strides = [1, 1]} : vector<8x5xf32> to vector<8x1xf32>
    %35 = vector.extract_strided_slice %5 {offsets = [0, 4], sizes = [1, 128], strides = [1, 1]} : vector<1x132xf32> to vector<1x128xf32>
    %36 = vector.broadcast %34 : vector<8x1xf32> to vector<8x128xf32>
    %37 = vector.broadcast %35 : vector<1x128xf32> to vector<8x128xf32>
    %38 = arith.mulf %36, %37 : vector<8x128xf32>
    %39 = arith.addf %33, %38 : vector<8x128xf32>
    %cst_11 = arith.constant 0.000000e+00 : f32
    %40 = vector.broadcast %cst_11 : f32 to vector<8x128xf32>
    %41 = arith.maximumf %39, %40 : vector<8x128xf32>
    %cst_12 = arith.constant 9.99999997E-7 : f32
    %42 = vector.broadcast %cst_12 : f32 to vector<8x128xf32>
    %43 = arith.addf %41, %42 : vector<8x128xf32>
    %44 = math.log %43 : vector<8x128xf32>
    %cst_13 = arith.constant dense<0.000000e+00> : vector<8xf32>
    %45 = vector.multi_reduction <add>, %44, %cst_13 [1] : vector<8x128xf32> to vector<8xf32>
    %46 = vector.shape_cast %45 : vector<8xf32> to vector<8x1xf32>
    %cst_14 = arith.constant 1.280000e+02 : f32
    %47 = vector.broadcast %cst_14 : f32 to vector<8x1xf32>
    %48 = arith.divf %46, %47 : vector<8x1xf32>
    %49 = vector.broadcast %48 : vector<8x1xf32> to vector<8x128xf32>
    %50 = arith.subf %44, %49 : vector<8x128xf32>
    %cst_15 = arith.constant 0.000000e+00 : f32
    %51 = vector.broadcast %cst_15 : f32 to vector<8x132xf32>
    %c0_16 = arith.constant 0 : index
    %c0_17 = arith.constant 0 : index
    %52 = vector.load %arg11[%c0_16, %c0_17] : memref<8x132xf32, #tpu.memory_space<vmem>>, vector<8x132xf32>
    tpu.vector_store %arg11[%c0_16, %c0_17], %51 {strides = array<i32>} : memref<8x132xf32, #tpu.memory_space<vmem>>, vector<8x132xf32>,
    %c0_18 = arith.constant 0 : index
    %c2_19 = arith.constant 2 : index
    %53 = vector.load %arg11[%c0_18, %c2_19] : memref<8x132xf32, #tpu.memory_space<vmem>>, vector<8x128xf32>
    tpu.vector_store %arg11[%c0_18, %c2_19], %50 {strides = array<i32>} : memref<8x132xf32, #tpu.memory_space<vmem>>, vector<8x128xf32>,
    %c0_20 = arith.constant 0 : index
    %c0_21 = arith.constant 0 : index
    %54 = vector.load %arg11[%c0_20, %c0_21] : memref<8x132xf32, #tpu.memory_space<vmem>>, vector<8x132xf32>
    %55 = vector.extract_strided_slice %54 {offsets = [0, 0], sizes = [8, 128], strides = [1, 1]} : vector<8x132xf32> to vector<8x128xf32>
    %c0_22 = arith.constant 0 : index
    %c0_23 = arith.constant 0 : index
    %56 = vector.load %arg12[%c0_22, %c0_23] : memref<40x128xf32, #tpu.memory_space<vmem>>, vector<8x128xf32>
    tpu.vector_store %arg12[%c0_22, %c0_23], %55 {strides = array<i32>} : memref<40x128xf32, #tpu.memory_space<vmem>>, vector<8x128xf32>,
    %57 = vector.extract_strided_slice %54 {offsets = [0, 1], sizes = [8, 128], strides = [1, 1]} : vector<8x132xf32> to vector<8x128xf32>
    %c8 = arith.constant 8 : index
    %c0_24 = arith.constant 0 : index
    %58 = vector.load %arg12[%c8, %c0_24] : memref<40x128xf32, #tpu.memory_space<vmem>>, vector<8x128xf32>
    tpu.vector_store %arg12[%c8, %c0_24], %57 {strides = array<i32>} : memref<40x128xf32, #tpu.memory_space<vmem>>, vector<8x128xf32>,
    %59 = vector.extract_strided_slice %54 {offsets = [0, 2], sizes = [8, 128], strides = [1, 1]} : vector<8x132xf32> to vector<8x128xf32>
    %c16 = arith.constant 16 : index
    %c0_25 = arith.constant 0 : index
    %60 = vector.load %arg12[%c16, %c0_25] : memref<40x128xf32, #tpu.memory_space<vmem>>, vector<8x128xf32>
    tpu.vector_store %arg12[%c16, %c0_25], %59 {strides = array<i32>} : memref<40x128xf32, #tpu.memory_space<vmem>>, vector<8x128xf32>,
    %61 = vector.extract_strided_slice %54 {offsets = [0, 3], sizes = [8, 128], strides = [1, 1]} : vector<8x132xf32> to vector<8x128xf32>
    %c24 = arith.constant 24 : index
    %c0_26 = arith.constant 0 : index
    %62 = vector.load %arg12[%c24, %c0_26] : memref<40x128xf32, #tpu.memory_space<vmem>>, vector<8x128xf32>
    tpu.vector_store %arg12[%c24, %c0_26], %61 {strides = array<i32>} : memref<40x128xf32, #tpu.memory_space<vmem>>, vector<8x128xf32>,
    %63 = vector.extract_strided_slice %54 {offsets = [0, 4], sizes = [8, 128], strides = [1, 1]} : vector<8x132xf32> to vector<8x128xf32>
    %c32 = arith.constant 32 : index
    %c0_27 = arith.constant 0 : index
    %64 = vector.load %arg12[%c32, %c0_27] : memref<40x128xf32, #tpu.memory_space<vmem>>, vector<8x128xf32>
    tpu.vector_store %arg12[%c32, %c0_27], %63 {strides = array<i32>} : memref<40x128xf32, #tpu.memory_space<vmem>>, vector<8x128xf32>,
    %c0_28 = arith.constant 0 : index
    %c0_29 = arith.constant 0 : index
    %65 = vector.load %arg4[%c0_28, %c0_29] : memref<32x40xf32, #tpu.memory_space<vmem>>, vector<32x40xf32>
    %c0_30 = arith.constant 0 : index
    %c0_31 = arith.constant 0 : index
    %66 = vector.load %arg12[%c0_30, %c0_31] : memref<40x128xf32, #tpu.memory_space<vmem>>, vector<40x128xf32>
    %cst_32 = arith.constant dense<0.000000e+00> : vector<32x128xf32>
    %67 = tpu.matmul %65, %66, %cst_32 {dimension_numbers = #tpu.dot_dimension_numbers<[1], [0], [0], [1], [0, 0, 1, 1], [], []>} : vector<32x40xf32>, vector<40x128xf32>, vector<32x128xf32> -> vector<32x128xf32>
    %c0_33 = arith.constant 0 : index
    %c0_34 = arith.constant 0 : index
    %68 = vector.load %arg5[%c0_33, %c0_34] : memref<32x1xf32, #tpu.memory_space<vmem>>, vector<32x1xf32>
    %69 = vector.broadcast %68 : vector<32x1xf32> to vector<32x128xf32>
    %70 = arith.addf %67, %69 : vector<32x128xf32>
    %cst_35 = arith.constant 0.000000e+00 : f32
    %71 = vector.broadcast %cst_35 : f32 to vector<32x128xf32>
    %72 = arith.maximumf %70, %71 : vector<32x128xf32>
    %c0_36 = arith.constant 0 : index
    %c0_37 = arith.constant 0 : index
    %73 = vector.load %arg6[%c0_36, %c0_37] : memref<32x1xf32, #tpu.memory_space<vmem>>, vector<32x1xf32>
    %74 = vector.broadcast %73 : vector<32x1xf32> to vector<32x128xf32>
    %75 = arith.mulf %72, %74 : vector<32x128xf32>
    %c0_38 = arith.constant 0 : index
    %c0_39 = arith.constant 0 : index
    %76 = vector.load %arg7[%c0_38, %c0_39] : memref<32x1xf32, #tpu.memory_space<vmem>>, vector<32x1xf32>
    %77 = vector.broadcast %76 : vector<32x1xf32> to vector<32x128xf32>
    %78 = arith.addf %75, %77 : vector<32x128xf32>
    %79 = vector.extract_strided_slice %78 {offsets = [0, 0], sizes = [16, 128], strides = [1, 1]} : vector<32x128xf32> to vector<16x128xf32>
    %c0_40 = arith.constant 0 : index
    %c0_41 = arith.constant 0 : index
    %c0_42 = arith.constant 0 : index
    %80 = vector.load %arg8[%c0_40, %c0_41, %c0_42] : memref<1x16x128xf32, #tpu.memory_space<vmem>>, vector<1x16x128xf32>
    %81 = vector.shape_cast %80 : vector<1x16x128xf32> to vector<16x128xf32>
    %82 = vector.shape_cast %79 : vector<16x128xf32> to vector<1x16x128xf32>
    tpu.vector_store %arg8[%c0_40, %c0_41, %c0_42], %82 {strides = array<i32>} : memref<1x16x128xf32, #tpu.memory_space<vmem>>, vector<1x16x128xf32>,
    %83 = vector.extract_strided_slice %78 {offsets = [16, 0], sizes = [16, 128], strides = [1, 1]} : vector<32x128xf32> to vector<16x128xf32>
    %c0_43 = arith.constant 0 : index
    %c0_44 = arith.constant 0 : index
    %c0_45 = arith.constant 0 : index
    %84 = vector.load %arg9[%c0_43, %c0_44, %c0_45] : memref<1x16x128xf32, #tpu.memory_space<vmem>>, vector<1x16x128xf32>
    %85 = vector.shape_cast %84 : vector<1x16x128xf32> to vector<16x128xf32>
    %86 = vector.shape_cast %83 : vector<16x128xf32> to vector<1x16x128xf32>
    tpu.vector_store %arg9[%c0_43, %c0_44, %c0_45], %86 {strides = array<i32>} : memref<1x16x128xf32, #tpu.memory_space<vmem>>, vector<1x16x128xf32>,
    return
  }
  func.func @transform_0(%arg0: i32) -> (i32, i32, i32) {
    %c0_i32 = arith.constant 0 : i32
    %c0_i32_0 = arith.constant 0 : i32
    %c0_i32_1 = arith.constant 0 : i32
    return %arg0, %c0_i32, %c0_i32_0 : i32, i32, i32
  }
  func.func @transform_1(%arg0: i32) -> (i32, i32) {
    %c0_i32 = arith.constant 0 : i32
    %c0_i32_0 = arith.constant 0 : i32
    %c0_i32_1 = arith.constant 0 : i32
    return %c0_i32, %c0_i32_0 : i32, i32
  }
  func.func @transform_2(%arg0: i32) -> (i32, i32) {
    %c0_i32 = arith.constant 0 : i32
    %c0_i32_0 = arith.constant 0 : i32
    %c0_i32_1 = arith.constant 0 : i32
    return %c0_i32, %c0_i32_0 : i32, i32
  }
  func.func @transform_3(%arg0: i32) -> (i32, i32) {
    %c0_i32 = arith.constant 0 : i32
    %c0_i32_0 = arith.constant 0 : i32
    %c0_i32_1 = arith.constant 0 : i32
    return %c0_i32, %c0_i32_0 : i32, i32
  }
  func.func @transform_4(%arg0: i32) -> (i32, i32) {
    %c0_i32 = arith.constant 0 : i32
    %c0_i32_0 = arith.constant 0 : i32
    %c0_i32_1 = arith.constant 0 : i32
    return %c0_i32, %c0_i32_0 : i32, i32
  }
  func.func @transform_5(%arg0: i32) -> (i32, i32) {
    %c0_i32 = arith.constant 0 : i32
    %c0_i32_0 = arith.constant 0 : i32
    %c0_i32_1 = arith.constant 0 : i32
    return %c0_i32, %c0_i32_0 : i32, i32
  }
  func.func @transform_6(%arg0: i32) -> (i32, i32) {
    %c0_i32 = arith.constant 0 : i32
    %c0_i32_0 = arith.constant 0 : i32
    %c0_i32_1 = arith.constant 0 : i32
    return %c0_i32, %c0_i32_0 : i32, i32
  }
  func.func @transform_7(%arg0: i32) -> (i32, i32, i32) {
    %c0_i32 = arith.constant 0 : i32
    %c0_i32_0 = arith.constant 0 : i32
    %c0_i32_1 = arith.constant 0 : i32
    return %arg0, %c0_i32, %c0_i32_0 : i32, i32, i32
  }
  func.func @transform_8(%arg0: i32) -> (i32, i32, i32) {
    %c0_i32 = arith.constant 0 : i32
    %c0_i32_0 = arith.constant 0 : i32
    %c0_i32_1 = arith.constant 0 : i32
    return %arg0, %c0_i32, %c0_i32_0 : i32, i32, i32
  }
}

</mosaic_0001>

<bundles_post_ra>
// kernel: cross_stitch_forward.1
= control target key start
LH: loop header
LB: loop body
LE: loop exit
PB: predicated region body
PF: predicated region fallthrough
CT: control target
= control target key end

     0   :  { %14 = vsyncpa [#allocation6], 0  ;;  %s1575_s0 = inlined_call_operand.hbm [shape: f32[2,1,128], index: 0, kind: input, shape index: {}]   ;;  %s1576_s1 = inlined_call_operand.hbm [shape: f32[8,5], index: 1, kind: input, shape index: {}]   ;;  %s1577_s2 = inlined_call_operand.vmem [shape: f32[8,1], index: 2, kind: input, shape index: {}]   ;;  %s1578_s3 = inlined_call_operand.hbm [shape: f32[32,40], index: 3, kind: input, shape index: {}]   ;;  %s1579_s4 = inlined_call_operand.hbm [shape: f32[32,1], index: 4, kind: input, shape index: {}]   ;;  %s1580_s5 = inlined_call_operand.hbm [shape: f32[32,1], index: 5, kind: input, shape index: {}]   ;;  %s1581_s6 = inlined_call_operand.hbm [shape: f32[32,1], index: 6, kind: input, shape index: {}]   ;;  %s1582_s7 = inlined_call_operand.vmem [shape: f32[2,16,128], index: 7, kind: output, shape index: {0}]   ;;  %s1583_s8 = inlined_call_operand.vmem [shape: f32[2,16,128], index: 8, kind: output, shape index: {1}]  }
   0x1   :  { %16 = vsyncpa [#allocation6 + $0x1], 0 }
   0x2   :  { %17 = vsyncpa [#allocation8], 0 }
   0x3   :  { %18 = vsyncpa [#allocation11], 0 }
   0x4   :  { %19 = vsyncpa [#allocation14], 0  ;;  %s1346_s27 = smov 0   ;;  %s1348_s28 = smov 0  }
   0x5   :  { %s1350_s29 = smov 0   ;;  %s1352_s30 = smov 0  }
   0x6 LB: > { %s1282_s9 = smov [#allocation7]   ;;  %s1367_s11 = sadd.s32 4294967295, %s1280_s30   ;;  %s1280_s30 = sphi %s1352_s30, %s1603_s30   ;;  %s1276_s29 = sphi %s1350_s29, %s1602_s29   ;;  %s1272_s28 = sphi %s1348_s28, %s1601_s28   ;;  %s1268_s27 = sphi %s1346_s27, %s1600_s27  }
   0x7   : > { %s247_s10 = sshll.u32 %s1282_s9, 4  ;;  %p904_p0 = scmp.ge.s32.totalorder %s1280_s30, 1  ;;  %s248_s10 = int_to_ptr.vmem [resolvable:$true] %s247_s10 }
   0x8   : > { %p1584_p1 = scmp.eq.s32.totalorder %s1367_s11, 0  ;;  %p234_p2 = scmp.lt.s32.totalorder %s1280_s30, 3 }
   0x9   : > { %s1283_s13 = smov [#allocation10]   ;;  %s1284_s16 = smov [#allocation9]  }
   0xa   : > { %p1372_p3 = pnand %p904_p0, %p234_p2  ;;  %s273_s14 = sshll.u32 %s1283_s13, 4  ;;  %s1384_s14 = int_to_ptr.vmem [resolvable:$true] %s273_s14 }
   0xb   : > { %s260_s17 = sshll.u32 %s1284_s16, 4  ;;  %s1087_s19 = scalar_lea.vmem %s248_s10, 128  ;;  %s1386_s17 = int_to_ptr.vmem [resolvable:$true] %s260_s17 }
   0xc   : > { %s1587_s12 = scalar_select %p1372_p3, 1, 0 }
   0xd   : > { %p987_p4 = pneg %p1372_p3  ;;  %p1088_p7 = scmp.ne.s32.totalorder %s248_s10, %s1087_s19 }
   0xe   : > { %p1095_p10 = scmp.lt.s32.totalorder %s248_s10, %s248_s10  ;;  %p1096_p11 = scmp.lt.s32.totalorder %s1087_s19, %s1087_s19 }
   0xf   : > { %p1380_p5 = pnand %p987_p4, %p1584_p1 }
  0x10   : > { %p1097_p12 = por %p1096_p11, %p1095_p10 }
  0x11   : > { %p1390_p6 = pneg %p1380_p5 }
  0x13   : > { %p1090_p8 = pnand %p1088_p7, %p1390_p6 }
  0x15   : > { %p1091_p9 = pneg %p1090_p8 }
  0x17   : > { %p1098_p13 = pnand %p1097_p12, %p1091_p9 }
  0x19   : > { %1101 = shalt.err (!%p1098_p13)
}
  0x1a   : > { %990 = dma.hbm_to_vmem [thread:$0]  (!%p1380_p5), %s1576_s1, 128, %s248_s10, [#allocation8]  }
  0x1b   : > { %s1113_s22 = scalar_lea.vmem %s1384_s14, 512  ;;  %p1121_p7 = scmp.lt.s32.totalorder %s1384_s14, %s1384_s14 }
  0x1c   : > { %p1114_p0 = scmp.ne.s32.totalorder %s1384_s14, %s1113_s22  ;;  %p1122_p8 = scmp.lt.s32.totalorder %s1113_s22, %s1113_s22 }
  0x1e   : > { %p1116_p2 = pnand %p1114_p0, %p1390_p6  ;;  %p1123_p9 = por %p1122_p8, %p1121_p7 }
  0x20   : > { %p1117_p4 = pneg %p1116_p2 }
  0x22   : > { %p1124_p10 = pnand %p1123_p9, %p1117_p4 }
  0x24   : > { %1127 = shalt.err (!%p1124_p10)
}
  0x25   : > { %s1285_s23 = smov 128   ;;  %s1286_s24 = smov 8  }
  0x26   : > { %996 = dma.hbm_to_vmem [thread:$0]  (!%p1380_p5), %s1579_s4, 512, %s1384_s14, [#allocation11], %s1285_s23, %s1285_s23, %s1286_s24  }
  0x27   : > { %s1139_s9 = scalar_lea.vmem %s1386_s17, 512  ;;  %p1147_p0 = scmp.lt.s32.totalorder %s1386_s17, %s1386_s17 }
  0x28   : > { %p1140_p11 = scmp.ne.s32.totalorder %s1386_s17, %s1139_s9  ;;  %p1148_p2 = scmp.lt.s32.totalorder %s1139_s9, %s1139_s9 }
  0x2a   : > { %p1142_p12 = pnand %p1140_p11, %p1390_p6  ;;  %p1149_p4 = por %p1148_p2, %p1147_p0 }
  0x2c   : > { %p1143_p13 = pneg %p1142_p12 }
  0x2e   : > { %p1150_p7 = pnand %p1149_p4, %p1143_p13 }
  0x30   : > { %1153 = shalt.err (!%p1150_p7)
}
  0x31   : > { %993 = dma.hbm_to_vmem [thread:$0]  (!%p1380_p5), %s1578_s3, 512, %s1386_s17, [#allocation8], %s1285_s23, %s1285_s23, %s1286_s24  }
  0x32   : > { %s1287_s14 = smov [#allocation12]   ;;  %s1288_s19 = smov [#allocation13]  }
  0x33   : > { %s286_s16 = sshll.u32 %s1287_s14, 4  ;;  %s299_s20 = sshll.u32 %s1288_s19, 4  ;;  %s287_s16 = int_to_ptr.vmem [resolvable:$true] %s286_s16  ;;  %s300_s20 = int_to_ptr.vmem [resolvable:$true] %s299_s20 }
  0x34   : > { %s1165_s21 = scalar_lea.vmem %s287_s16, 512  ;;  %p1173_p11 = scmp.lt.s32.totalorder %s287_s16, %s287_s16 }
  0x35   : > { %p1166_p8 = scmp.ne.s32.totalorder %s287_s16, %s1165_s21  ;;  %p1174_p12 = scmp.lt.s32.totalorder %s1165_s21, %s1165_s21 }
  0x37   : > { %p1168_p9 = pnand %p1166_p8, %p1390_p6  ;;  %p1175_p13 = por %p1174_p12, %p1173_p11 }
  0x39   : > { %p1169_p10 = pneg %p1168_p9 }
  0x3b   : > { %p1176_p0 = pnand %p1175_p13, %p1169_p10 }
  0x3d   : > { %1179 = shalt.err (!%p1176_p0)
}
  0x3e   : > { %999 = dma.hbm_to_vmem [thread:$0]  (!%p1380_p5), %s1580_s5, 512, %s287_s16, [#allocation11], %s1285_s23, %s1285_s23, %s1286_s24  }
  0x3f   : > { %s1191_s25 = scalar_lea.vmem %s300_s20, 512  ;;  %p1199_p8 = scmp.lt.s32.totalorder %s300_s20, %s300_s20 }
  0x40   : > { %p1192_p2 = scmp.ne.s32.totalorder %s300_s20, %s1191_s25  ;;  %p1200_p9 = scmp.lt.s32.totalorder %s1191_s25, %s1191_s25 }
  0x42   : > { %p1194_p4 = pnand %p1192_p2, %p1390_p6  ;;  %p1201_p10 = por %p1200_p9, %p1199_p8 }
  0x44   : > { %p1195_p7 = pneg %p1194_p4 }
  0x46   : > { %p1202_p11 = pnand %p1201_p10, %p1195_p7 }
  0x48   : > { %1205 = shalt.err (!%p1202_p11)
}
  0x49   : > { %1002 = dma.hbm_to_vmem [thread:$0]  (!%p1380_p5), %s1581_s6, 512, %s300_s20, [#allocation14], %s1285_s23, %s1285_s23, %s1286_s24  }
  0x4a   : > { %s1452_s15 = sadd.s32 1, %s1280_s30   ;;  %s32_s10 = sadd.s32 1, %s1276_s29 }
  0x4b   : > { %s29_s18 = ssub.s32 %s1280_s30, %s1452_s15  ;;  %p39_p12 = scmp.ne.s32.totalorder %s1276_s29, %s1272_s28 }
  0x4c   : > { %p30_p6 = scmp.eq.s32.totalorder %s29_s18, 0  ;;  %p40_p13 = scmp.eq.s32.totalorder %s1280_s30, 0 }
  0x4d   : > { %p45_p0 = scmp.ne.s32.totalorder %s1272_s28, %s1268_s27  ;;  %p1012_p7 = scmp.lt.s32.totalorder %s1280_s30, 2 }
  0x4e   : > { %s1463_s13 = scalar_select %p30_p6, %s1276_s29, %s32_s10  }
  0x4f   : > { %p41_p2 = por %p40_p13, %p39_p12  ;;  %p1467_p4 = por %p1584_p1, %p45_p0 }
  0x50   : > { %s313_s16 = sand.u32 1, %s1276_s29   ;;  %s911_s23 = sshll.u32 %s1280_s30, 4 }
  0x51   : > { %s1590_s14 = scalar_select %p1467_p4, 1, 0 }
  0x52   : > { %s316_s24 = scalar_lea.vmem [#allocation5], %s313_s16  ;;  %s1477_s17 = scalar_lea.hbm %s1575_s0, %s911_s23 }
  0x53   : > { %s323_s19 = sshll.u32 %s316_s24, 4  ;;  %p1479_p5 = pnand %p1012_p7, %p41_p2  ;;  %s324_s19 = int_to_ptr.vmem [resolvable:$true] %s323_s19 }
  0x54   : > { %s314_s22 = scalar_lea.sflag [#allocation6], %s313_s16  ;;  %s1206_s25 = scalar_lea.hbm %s1477_s17, 16 }
  0x55   : > { %p1207_p8 = scmp.ne.s32.totalorder %s1477_s17, %s1206_s25  ;;  %p1208_p9 = pneg %p1479_p5 }
  0x56   : > { %s1211_s9 = scalar_lea.hbm %s1575_s0, 32  ;;  %p1212_p6 = scmp.lt.s32.totalorder %s1477_s17, %s1575_s0 }
  0x57   : > { %p1209_p10 = pnand %p1208_p9, %p1207_p8  ;;  %p1213_p12 = scmp.lt.s32.totalorder %s1211_s9, %s1206_s25 }
  0x59   : > { %p1210_p11 = pneg %p1209_p10  ;;  %p1214_p13 = por %p1213_p12, %p1212_p6 }
  0x5b   : > { %p1215_p0 = pnand %p1214_p13, %p1210_p11 }
  0x5d   : > { %1218 = shalt.err (!%p1215_p0)
}
  0x5e   : > { %s1219_s23 = scalar_lea.vmem %s324_s19, 16  ;;  %s1289_s16 = smov [#allocation5]  }
  0x5f   : > { %p1220_p2 = scmp.ne.s32.totalorder %s324_s19, %s1219_s23  ;;  %s1224_s24 = sshll.u32 %s1289_s16, 4  ;;  %s1225_s24 = int_to_ptr.vmem [resolvable:$false] %s1224_s24 }
  0x60   : > { %s1226_s20 = scalar_lea.vmem %s1225_s24, 32  ;;  %p1227_p8 = scmp.lt.s32.totalorder %s324_s19, %s1225_s24 }
  0x61   : > { %p1222_p7 = pnand %p1220_p2, %p1208_p9  ;;  %p1228_p10 = scmp.lt.s32.totalorder %s1226_s20, %s1219_s23 }
  0x63   : > { %p1223_p1 = pneg %p1222_p7  ;;  %p1229_p4 = por %p1228_p10, %p1227_p8 }
  0x65   : > { %p1230_p3 = pnand %p1229_p4, %p1223_p1 }
  0x67   : > { %1233 = shalt.err (!%p1230_p3)
}
  0x68   : > { %1006 = dma.hbm_to_vmem [thread:$0]  (!%p1479_p5), %s1477_s17, 16, %s324_s19, %s314_s22  }
  0x69   : > { %p1592_p11 = scmp.ne.s32.totalorder %s1587_s12, 0 }
  0x6a   : > { %s334_s21 = sand.u32 (!%p1592_p11), 1, %s1272_s28   ;;  %p1593_p9 = scmp.ne.s32.totalorder (!%p1592_p11), %s1590_s14, 0 }
  0x6b   : > { %332 = sbr.rel (%p1592_p11) target bundleno = 1021 (0x3fd), region = 48  ;;  %s335_s25 = scalar_lea.sflag (!%p1592_p11), [#allocation6], %s334_s21 }
  0x6c   : > { %s337_s30 = scalar_lea.vmem (!%p1592_p11), [#allocation5], %s334_s21 }
  0x70   : > { %1251 = dma.done.wait (%p1593_p9), %s335_s25, 16  }
  0x71   : > { %1253 = vsyncadd (%p1593_p9), %s335_s25, 4294967280  ;;  %p1594_p1 = scmp.eq.s32.totalorder %s1367_s11, 0 }
  0x73   : > { %1255 = dma.done.wait (%p1594_p1), [#allocation8], 640   ;;  %p1595_p3 = pmov %p1594_p1 }
  0x74   : > { %p1596_p4 = pmov %p1594_p1 }
  0x75   : > { %1257 = vsyncadd (%p1595_p3), [#allocation8], 4294966656 }
  0x76   : > { %1259 = dma.done.wait (%p1596_p4), [#allocation11], 1024   ;;  %p1597_p5 = pmov %p1594_p1 }
  0x77   : > { %p1598_p6 = pmov %p1594_p1 }
  0x78   : > { %1261 = vsyncadd (%p1597_p5), [#allocation11], 4294966272 }
  0x79   : > { %1263 = dma.done.wait (%p1598_p6), [#allocation14], 512   ;;  %p1599_p12 = pmov %p1594_p1 }
  0x7a   : > { %v404_v0 = vlaneseq  ;;  %v1290_v1 = vmov 2   ;;  %v1291_v2 = vmov 1   ;;  %v1292_v3 = vmov 0.0   ;;  %v422_v4 = vld [vmem:[#allocation7] sm:$0xff]  ;;  %v409_v5 = vld [vmem:[%s337_s30] sm:$0x1] }
  0x7b   : > { %1265 = vsyncadd (%p1599_p12), [#allocation14], 4294966784  ;;  %1069 = vset.pattern.permute.xlu1 %v1290_v1  ;;  %1068 = vset.pattern.permute.xlu0 %v1291_v2  ;;  %520 = vst [vmem:[#allocation3] sm:$0xff] %v1292_v3  ;;  %s1293_s12 = smov 2   ;;  %v1294_v6 = vmov 3   ;;  %v1295_v7 = vmov 0  }
  0x7c   : > { %vm406_vm0 = vcmp.lt.s32.totalorder %v404_v0, 132  ;;  %464 = vperm.xlu1 %1069, %v422_v4   ;;  %411 = vrot.lane.b32.xlu0 %v409_v5, %s1293_s12  ;;  %v1296_v8 = vmov 4   ;;  %v423_v9 = vld [vmem:[%s1577_s2] sm:$0xff]  ;;  %vm417_vm1 = vcmp.ge.s32.totalorder %v404_v0, 2  ;;  %vm418_vm2 = vcmp.lt.s32.totalorder %v404_v0, 130  ;;  %s1297_s17 = smov 127  }
  0x7d   : > { %408 = vst.msk [vmem:[#allocation2] sm:$0x3] %vm406_vm0, %v1292_v3  ;;  %vm414_vm3 = vcmask 15360   ;;  %vm419_vm4 = vmand %vm417_vm1, %vm418_vm2  ;;  %v436_v13 = vshrl.u32 %v404_v0, 7  ;;  %s1298_s27 = smov 126   ;;  %s1299_s22 = smov 125  }
  0x7e   : > { %s1300_s26 = smov 124   ;;  %vm459_vm5 = vcmask 1039360   ;;  %vm475_vm6 = vcmask 1031168   ;;  %vm491_vm7 = vcmask 1022976   ;;  %vm507_vm8 = vcmask 1014784   ;;  %v572_v55 = vld [vmem:[#allocation10] sm:$0xff] }
  0x7f   : > { %v437_v14 = vsub.s32 0, %v436_v13  ;;  %v448_v15 = vsub.s32 1, %v436_v13  ;;  %v699_v56 = vld [vmem:[#allocation12 + $0x8] sm:$0xff]  ;;  %v701_v57 = vld [vmem:[#allocation12 + $0x18] sm:$0xff]  ;;  %vm521_vm9 = vcmask 31744   ;;  %vm527_vm10 = vcmask 1047568  }
  0x80   : > { %1070 = vset.pattern.permute.xlu1 %v1294_v6  ;;  %443 = vperm.xlu0 %1068, %v422_v4   ;;  %v727_v58 = vld [vmem:[#allocation13 + $0x8] sm:$0xff]  ;;  %v729_v59 = vld [vmem:[#allocation13 + $0x18] sm:$0xff]  ;;  %522 = vst.msk [vmem:[#allocation3 + $0x8] sm:$0xff] %vm521_vm9, %v1292_v3  ;;  %v563_v2 = vld [vmem:[#allocation9] sm:$0xff]  ;;  %vm596_vm11 = vcmask 326656   ;;  %p394_p13 = scmp.lt.s32.totalorder %s1367_s11, 1 }
  0x81   : > { %480 = vperm.xlu1 %1070, %v422_v4   ;;  %v565_v3 = vld [vmem:[#allocation9 + $0x10] sm:$0xff]  ;;  %949 = vmatprep.mubr.msk.f32.mxu0 %vm596_vm11, %v563_v2  ;;  %v575_v6 = vld [vmem:[#allocation10 + $0x18] sm:$0xff] }
  0x82   : > { %952 = vmatprep.mubr.msk.f32.mxu1 %vm596_vm11, %v565_v3  ;;  %v574_v5 = vld [vmem:[#allocation10 + $0x10] sm:$0xff]  ;;  %s1605_s11 = smov (!%p394_p13, %s1367_s11), 1 }
  0x83   : > { %s928_s9 = sshll.u32 %s1605_s11, 4 }
  0x84   : > { %1072 = vset.pattern.permute.xlu0 %v1295_v7  ;;  %s398_s23 = scalar_lea.vmem %s1582_s7, %s928_s9  ;;  %s403_s20 = scalar_lea.vmem %s1583_s8, %s928_s9 }
  0x85   : > { %1071 = vset.pattern.permute.xlu1 %v1296_v8  ;;  %431 = vperm.xlu0 %1072, %v422_v4   ;;  %v700_v8 = vld [vmem:[#allocation12 + $0x10] sm:$0xff] }
  0x86   : > { %496 = vperm.xlu1 %1071, %v422_v4   ;;  %v573_v4 = vld [vmem:[#allocation10 + $0x8] sm:$0xff] }
  0x8a   : > { %1073 = vset.pattern.permute.xlu1 %v1295_v7  ;;  %v698_v7 = vld [vmem:[#allocation12] sm:$0xff] }
  0x8b   : > { %426 = vperm.xlu1 %1073, %v423_v9   ;;  %v726_v9 = vld [vmem:[#allocation13] sm:$0xff] }
  0xee   : > { %v412_v10 = vpop.permute.xlu0 %411 }
  0xef   : > { %v413_v11 = vrot.slane %v412_v10, 7 }
  0xf1   : > { %v415_v12 = vsel %vm414_vm3, %v413_v11, %v412_v10  ;;  %v728_v10 = vld [vmem:[#allocation13 + $0x10] sm:$0xff] }
  0xf2   : > { %420 = vst.msk [vmem:[#allocation2] sm:$0x3] %vm419_vm4, %v415_v12 }
  0xf7   : > { %v465_v16 = vpop.permute.xlu1 %464 }
  0xf9   : > { %v421_v17 = vld [vmem:[#allocation2] sm:$0x3] }
  0xfa   : > { %v438_v18 = vrot.slane %v421_v17, %v437_v14  ;;  %v449_v19 = vrot.slane %v421_v17, %v448_v15 }
  0xfb   : > { %v444_v20 = vpop.permute.xlu0 %443 }
  0xfc   : > { %v451_v21 = vmul.f32 %v444_v20, %v438_v18  ;;  %v452_v22 = vmul.f32 %v449_v19, %v444_v20  ;;  %v481_v23 = vpop.permute.xlu1 %480  ;;  %v467_v24 = vmul.f32 %v465_v16, %v438_v18  ;;  %v468_v25 = vmul.f32 %v465_v16, %v449_v19 }
  0xfd   : > { %v483_v26 = vmul.f32 %v481_v23, %v438_v18  ;;  %v484_v27 = vmul.f32 %v481_v23, %v449_v19  ;;  %v564_v23 = vld [vmem:[#allocation9 + $0x8] sm:$0xff] }
  0xfe   : > { %457 = vrot.lane.b32.xlu0 %v452_v22, %s1297_s17  ;;  %455 = vrot.lane.b32.xlu1 %v451_v21, %s1297_s17 }
 0x100   : > { %v432_v31 = vpop.permute.xlu0 %431 }
 0x101   : > { %v497_v28 = vpop.permute.xlu1 %496  ;;  %v440_v35 = vmul.f32 %v438_v18, %v432_v31 }
 0x102   : > { %473 = vrot.lane.b32.xlu0 %v468_v25, %s1298_s27  ;;  %471 = vrot.lane.b32.xlu1 %v467_v24, %s1298_s27  ;;  %v499_v29 = vmul.f32 %v497_v28, %v438_v18  ;;  %v500_v30 = vmul.f32 %v497_v28, %v449_v19  ;;  %v566_v24 = vld [vmem:[#allocation9 + $0x18] sm:$0xff] }
 0x106   : > { %489 = vrot.lane.b32.xlu0 %v484_v27, %s1299_s22  ;;  %487 = vrot.lane.b32.xlu1 %v483_v26, %s1299_s22  ;;  %v427_v32 = vpop.permute.xlu1 %426 }
 0x107   : > { %v441_v39 = vadd.f32 %v440_v35, %v427_v32 }
 0x10a   : > { %505 = vrot.lane.b32.xlu0 %v500_v30, %s1300_s26  ;;  %503 = vrot.lane.b32.xlu1 %v499_v29, %s1300_s26 }
 0x170   : > { %v458_v33 = vpop.permute.xlu0 %457  ;;  %v456_v34 = vpop.permute.xlu1 %455 }
 0x171   : > { %v460_v38 = vsel %vm459_vm5, %v456_v34, %v458_v33 }
 0x172   : > { %v462_v41 = vadd.f32 %v460_v38, %v441_v39 }
 0x174   : > { %v474_v36 = vpop.permute.xlu0 %473  ;;  %v472_v37 = vpop.permute.xlu1 %471 }
 0x175   : > { %v476_v40 = vsel %vm475_vm6, %v472_v37, %v474_v36 }
 0x176   : > { %v478_v45 = vadd.f32 %v476_v40, %v462_v41 }
 0x178   : > { %v490_v42 = vpop.permute.xlu0 %489  ;;  %v488_v43 = vpop.permute.xlu1 %487 }
 0x179   : > { %v492_v44 = vsel %vm491_vm7, %v488_v43, %v490_v42 }
 0x17a   : > { %v494_v46 = vadd.f32 %v492_v44, %v478_v45 }
 0x17c   : > { %v506_v47 = vpop.permute.xlu0 %505  ;;  %v504_v48 = vpop.permute.xlu1 %503 }
 0x17d   : > { %v508_v49 = vsel %vm507_vm8, %v504_v48, %v506_v47 }
 0x17e   : > { %v510_v50 = vadd.f32 %v508_v49, %v494_v46 }
 0x180   : > { %v511_v51 = vmax.f32 %v510_v50, 0.0 }
 0x182   : > { %v512_v52 = vadd.f32 1e-06, %v511_v51 }
 0x184   : > { %1074 = vlog2.f32 %v512_v52 }
 0x191   : > { %v1075_v53 = vpop.eup %1074 }
 0x192   : > { %v514_v54 = vmul.f32 0.6931472, %v1075_v53 }
 0x194   : > { %515 = vadd.xlane.f32.xlu1 %v514_v54 }
 0x1a5   : > { %578 = vperm.xlu1 %1073, %v572_v55  }
 0x1a9   : > { %709 = vperm.xlu1 %1073, %v699_v56  }
 0x1ad   : > { %719 = vperm.xlu1 %1073, %v701_v57  }
 0x1b1   : > { %737 = vperm.xlu1 %1073, %v727_v58  }
 0x1b5   : > { %747 = vperm.xlu1 %1073, %v729_v59  }
 0x21d   : > { %v516_v60 = vpop.xlane.xlu1 %515 }
 0x21e   : > { %v518_v61 = vmul.f32 0.0078125, %v516_v60 }
 0x220   : > { %v519_v62 = vsub.f32 %v514_v54, %v518_v61 }
 0x221   : > { %v579_v27 = vpop.permute.xlu1 %578 }
 0x222   : > { %524 = vrot.lane.b32.xlu0 %v519_v62, %s1293_s12 }
 0x225   : > { %v710_v29 = vpop.permute.xlu1 %709 }
 0x229   : > { %v720_v31 = vpop.permute.xlu1 %719 }
 0x22d   : > { %v738_v33 = vpop.permute.xlu1 %737 }
 0x231   : > { %v748_v49 = vpop.permute.xlu1 %747 }
 0x294   : > { %v525_v63 = vpop.permute.xlu0 %524 }
 0x295   : > { %528 = vst.msk [vmem:[#allocation3] sm:$0xff] %vm527_vm10, %v525_v63 }
 0x296   : > { %529 = vst.msk [vmem:[#allocation3 + $0x8] sm:$0xff] %vm414_vm3, %v525_v63 }
 0x29c   : > { %v530_v0 = vld [vmem:[#allocation3] sm:$0xff] }
 0x29d   : > { %556 = vrot.lane.b32.xlu0 %v530_v0, %s1300_s26  ;;  %v531_v1 = vld [vmem:[#allocation3 + $0x8] sm:$0xff] }
 0x2a1   : > { %558 = vrot.lane.b32.xlu0 %v531_v1, %s1300_s26 }
 0x2a5   : > { %549 = vrot.lane.b32.xlu0 %v530_v0, %s1299_s22 }
 0x2a9   : > { %551 = vrot.lane.b32.xlu0 %v531_v1, %s1299_s22 }
 0x2ad   : > { %542 = vrot.lane.b32.xlu0 %v530_v0, %s1298_s27 }
 0x2b1   : > { %544 = vrot.lane.b32.xlu0 %v531_v1, %s1298_s27 }
 0x2b5   : > { %535 = vrot.lane.b32.xlu0 %v530_v0, %s1297_s17 }
 0x2b9   : > { %537 = vrot.lane.b32.xlu0 %v531_v1, %s1297_s17 }
 0x2bd   : > { %583 = vperm.xlu0 %1072, %v573_v4  }
 0x2c1   : > { %588 = vperm.xlu0 %1072, %v574_v5  }
 0x2c5   : > { %593 = vperm.xlu0 %1072, %v575_v6  }
 0x2c9   : > { %704 = vperm.xlu0 %1072, %v698_v7  }
 0x2cd   : > { %714 = vperm.xlu0 %1072, %v700_v8  }
 0x2d1   : > { %732 = vperm.xlu0 %1072, %v726_v9  }
 0x2d5   : > { %742 = vperm.xlu0 %1072, %v728_v10  }
 0x30f   : > { %v557_v11 = vpop.permute.xlu0 %556 }
 0x313   : > { %v559_v12 = vpop.permute.xlu0 %558 }
 0x314   : > { %v560_v13 = vsel %vm507_vm8, %v557_v11, %v559_v12 }
 0x315   : > { %939 = vmatprep.subr.mxu0 %v560_v13  ;;  %955 = vmatprep.subr.mxu1 %v560_v13 }
 0x316   : > { %940 = vmatpush3.msra.mxu0 %v560_v13  ;;  %960 = vmatpush3.msra.mxu1 %v560_v13 }
 0x317   : > { %v550_v14 = vpop.permute.xlu0 %549 }
 0x31b   : > { %v552_v15 = vpop.permute.xlu0 %551 }
 0x31c   : > { %v553_v16 = vsel %vm491_vm7, %v550_v14, %v552_v15 }
 0x31d   : > { %941 = vmatprep.subr.mxu0 %v553_v16  ;;  %956 = vmatprep.subr.mxu1 %v553_v16 }
 0x31e   : > { %942 = vmatpush3.msra.mxu0 %v553_v16  ;;  %961 = vmatpush3.msra.mxu1 %v553_v16 }
 0x31f   : > { %v543_v17 = vpop.permute.xlu0 %542 }
 0x323   : > { %v545_v18 = vpop.permute.xlu0 %544 }
 0x324   : > { %v546_v19 = vsel %vm475_vm6, %v543_v17, %v545_v18 }
 0x325   : > { %943 = vmatprep.subr.mxu0 %v546_v19  ;;  %957 = vmatprep.subr.mxu1 %v546_v19 }
 0x326   : > { %944 = vmatpush3.msra.mxu0 %v546_v19  ;;  %962 = vmatpush3.msra.mxu1 %v546_v19 }
 0x327   : > { %v536_v20 = vpop.permute.xlu0 %535 }
 0x32b   : > { %v538_v21 = vpop.permute.xlu0 %537 }
 0x32c   : > { %v539_v22 = vsel %vm459_vm5, %v536_v20, %v538_v21 }
 0x32d   : > { %945 = vmatprep.subr.mxu0 %v539_v22  ;;  %958 = vmatprep.subr.mxu1 %v539_v22 }
 0x32e   : > { %946 = vmatpush3.msra.mxu0 %v539_v22  ;;  %963 = vmatpush3.msra.mxu1 %v539_v22 }
 0x32f   : > { %947 = vmatprep.subr.mxu0 %v530_v0  ;;  %959 = vmatprep.subr.mxu1 %v530_v0 }
 0x330   : > { %948 = vmatpush3.msra.mxu0 %v530_v0  ;;  %964 = vmatpush3.msra.mxu1 %v530_v0 }
 0x331   : > { %950 = vmatmul.mubr.msk.f32.vlgmr.msra.gmra.mxu0 %vm596_vm11, %v564_v23  ;;  %953 = vmatmul.mubr.msk.f32.vlgmr.msra.gmra.mxu1 %vm596_vm11, %v566_v24 }
 0x338   : > { %v584_v25 = vpop.permute.xlu0 %583 }
 0x33c   : > { %v589_v26 = vpop.permute.xlu0 %588 }
 0x340   : > { %v594_v28 = vpop.permute.xlu0 %593 }
 0x344   : > { %v705_v30 = vpop.permute.xlu0 %704 }
 0x348   : > { %v715_v32 = vpop.permute.xlu0 %714 }
 0x34c   : > { %v733_v36 = vpop.permute.xlu0 %732 }
 0x350   : > { %v743_v54 = vpop.permute.xlu0 %742 }
 0x3f1   : > { %v951_v34 = vpop.f32.mrf.mxu0  ;;  %v954_v35 = vpop.f32.mrf.mxu1 }
 0x3f2   : > { %v681_v37 = vadd.f32 %v951_v34, %v584_v25  ;;  %v691_v38 = vadd.f32 %v954_v35, %v594_v28 }
 0x3f3   : > { %v675_v39 = vpop.f32.mrf.mxu0  ;;  %v685_v40 = vpop.f32.mrf.mxu1 }
 0x3f4   : > { %v695_v41 = vmax.f32 %v681_v37, 0.0  ;;  %v697_v42 = vmax.f32 %v691_v38, 0.0  ;;  %v676_v43 = vadd.f32 %v675_v39, %v579_v27  ;;  %v686_v44 = vadd.f32 %v685_v40, %v589_v26 }
 0x3f6   : > { %v723_v45 = vmul.f32 %v710_v29, %v695_v41  ;;  %v725_v46 = vmul.f32 %v720_v31, %v697_v42  ;;  %v694_v47 = vmax.f32 %v676_v43, 0.0  ;;  %v696_v48 = vmax.f32 %v686_v44, 0.0 }
 0x3f8   : > { %v751_v50 = vadd.f32 %v738_v33, %v723_v45  ;;  %v753_v51 = vadd.f32 %v748_v49, %v725_v46  ;;  %v722_v52 = vmul.f32 %v705_v30, %v694_v47  ;;  %v724_v53 = vmul.f32 %v715_v32, %v696_v48 }
 0x3fa   : > { %755 = vst [vmem:[%s398_s23 + $0x8] sm:$0xff] %v751_v50  ;;  %757 = vst [vmem:[%s403_s20 + $0x8] sm:$0xff] %v753_v51  ;;  %v750_v55 = vadd.f32 %v733_v36, %v722_v52  ;;  %v752_v56 = vadd.f32 %v743_v54, %v724_v53 }
 0x3fc   : > { %754 = vst [vmem:[%s398_s23] sm:$0xff] %v750_v55  ;;  %756 = vst [vmem:[%s403_s20] sm:$0xff] %v752_v56 }
 0x3fd PF: > { %p22_p0 = scmp.ge.s32.totalorder %s1452_s15, 4   ;;  %s1600_s27 = smov %s1272_s28 }
 0x3fe   : > { %s1601_s28 = smov %s1276_s29  ;;  %s1602_s29 = smov %s1463_s13 }
 0x3ff   : > { %s1603_s30 = smov %s1452_s15  ;;  %24 = sbr.rel (!%p22_p0) target bundleno = 6 (0x6), region = 120 }
 0x404   :  { %795 = vsyncpa [#allocation6], 1 }
 0x405   :  { %797 = vsyncpa [#allocation6 + $0x1], 1 }
 0x406   :  { %798 = vsyncpa [#allocation8], 1 }
 0x407   :  { %799 = vsyncpa [#allocation11], 1 }
 0x408   :  { %800 = vsyncpa [#allocation14], 1 }

</bundles_post_ra>
